<compile_context>
chip_gen: v5e
topology: v5e:2x2
jax: 0.10.0
libtpu: 0.0.40
codegen_flags: <defaults>
</compile_context>

<pallas_src>
import jax
import jax.numpy as jnp
from jax.experimental import pallas as pl
from jax.experimental.pallas import tpu as pltpu

LANES = 128        # vreg lane width: output last dim kept a multiple of 128
TILE_ROWS = 1024   # 1024 x 128 f32 = 512 KiB per buffer; 4 buffers (in+out,
                   # double-buffered) = 2 MiB << scoped VMEM on v5e/v6e/v7x.


def lrm_kernel(w_ref, b_ref, x_ref, o_ref):
    # w_ref / b_ref: (1,) scalars in SMEM; x_ref / o_ref: (tile_rows, 128) in VMEM.
    o_ref[...] = w_ref[0] * x_ref[...] + b_ref[0]


def lrm_forward(x, weight, bias):
    """y = weight * x + bias with scalar weight/bias; returns same shape as x."""
    orig_shape = x.shape
    xf = x.reshape(-1)
    if xf.dtype != jnp.float32:   # avoid an extra HBM pass when already float32
        xf = xf.astype(jnp.float32)
    n = xf.shape[0]

    # Lane-dense layout: pad the flat array up to a (rows_padded, 128) slab whose
    # row count is tile-divisible (and a multiple of 8 for the (8,128) rule).
    rows = -(-n // LANES)
    if rows <= TILE_ROWS:
        rows_padded = max(8, -(-rows // 8) * 8)
        tile_rows = rows_padded
    else:
        rows_padded = -(-rows // TILE_ROWS) * TILE_ROWS
        tile_rows = TILE_ROWS
    padded_n = rows_padded * LANES
    if padded_n != n:
        xf = jnp.pad(xf, (0, padded_n - n))
    x2d = xf.reshape(rows_padded, LANES)

    w1 = weight.reshape(1).astype(jnp.float32)
    b1 = bias.reshape(1).astype(jnp.float32)

    grid = (rows_padded // tile_rows,)
    y2d = pl.pallas_call(
        lrm_kernel,
        out_shape=jax.ShapeDtypeStruct((rows_padded, LANES), jnp.float32),
        grid=grid,
        in_specs=[
            pl.BlockSpec(memory_space=pltpu.SMEM),               # weight scalar
            pl.BlockSpec(memory_space=pltpu.SMEM),               # bias scalar
            pl.BlockSpec((tile_rows, LANES), lambda i: (i, 0)),  # x tile
        ],
        out_specs=pl.BlockSpec((tile_rows, LANES), lambda i: (i, 0)),
        compiler_params=pltpu.CompilerParams(
            dimension_semantics=("parallel",)),  # shard row-tiles across TCs (v7x)
    )(w1, b1, x2d)

    # Drop the padded tail (padded lanes computed w*0+b but are never visible).
    return y2d.reshape(-1)[:n].reshape(orig_shape)


if __name__ == "__main__":
    # Deterministic "parameters" (module __init__: randn(1) weight, randn(1) bias).
    key = jax.random.PRNGKey(0)
    kw, kb = jax.random.split(key)
    weight = jax.random.normal(kw, (1,), dtype=jnp.float32)
    bias = jax.random.normal(kb, (1,), dtype=jnp.float32)

    # Input matching the PyTorch script: torch.arange(0, 1, 0.02).unsqueeze(1) -> (50, 1)
    x = jnp.arange(0.0, 1.0, 0.02, dtype=jnp.float32)[:, None]
    y = jax.block_until_ready(lrm_forward(x, weight, bias))
    y_ref = weight[0] * x + bias[0]
    assert y.shape == x.shape
    assert jnp.allclose(y, y_ref, atol=1e-6), "mismatch vs reference (small)"

    # Second check exercising the multi-tile grid + padded-tail path.
    x_big = jax.random.normal(
        jax.random.PRNGKey(1), (3 * TILE_ROWS * LANES + 77, 1), dtype=jnp.float32)
    y_big = jax.block_until_ready(lrm_forward(x_big, weight, bias))
    assert jnp.allclose(y_big, weight[0] * x_big + bias[0], atol=1e-6), \
        "mismatch vs reference (large)"

    print("KERNEL_OK")
</pallas_src>

<mosaic_0001>
module attributes {stable_mosaic.version = 11 : i64} {
  func.func @lrm_kernel(%arg0: i32, %arg1: memref<1xf32, #tpu.memory_space<smem>>, %arg2: memref<1xf32, #tpu.memory_space<smem>>, %arg3: memref<8x128xf32, #tpu.memory_space<vmem>>, %arg4: memref<8x128xf32, #tpu.memory_space<vmem>>) attributes {dimension_semantics = [#tpu.dimension_semantics<parallel>], iteration_bounds = array<i64: 1>, scalar_prefetch = 0 : i64, scratch_operands = 0 : i64, tpu.core_type = #tpu.core_type<tc>, window_params = [{transform_indices = @transform_0, window_bounds = array<i64: 1>}, {transform_indices = @transform_1, window_bounds = array<i64: 1>}, {transform_indices = @transform_2, window_bounds = array<i64: 8, 128>}, {transform_indices = @transform_3, window_bounds = array<i64: 8, 128>}]} {
    %c0 = arith.constant 0 : index
    %0 = memref.load %arg1[%c0] : memref<1xf32, #tpu.memory_space<smem>>
    %c0_0 = arith.constant 0 : index
    %c0_1 = arith.constant 0 : index
    %1 = vector.load %arg3[%c0_0, %c0_1] : memref<8x128xf32, #tpu.memory_space<vmem>>, vector<8x128xf32>
    %2 = vector.broadcast %0 : f32 to vector<8x128xf32>
    %3 = arith.mulf %2, %1 : vector<8x128xf32>
    %c0_2 = arith.constant 0 : index
    %4 = memref.load %arg2[%c0_2] : memref<1xf32, #tpu.memory_space<smem>>
    %5 = vector.broadcast %4 : f32 to vector<8x128xf32>
    %6 = arith.addf %3, %5 : vector<8x128xf32>
    %c0_3 = arith.constant 0 : index
    %c0_4 = arith.constant 0 : index
    %7 = vector.load %arg4[%c0_3, %c0_4] : memref<8x128xf32, #tpu.memory_space<vmem>>, vector<8x128xf32>
    tpu.vector_store %arg4[%c0_3, %c0_4], %6 {strides = array<i32>} : memref<8x128xf32, #tpu.memory_space<vmem>>, vector<8x128xf32>,
    return
  }
  func.func @transform_0(%arg0: i32) -> i32 {
    %c0_i32 = arith.constant 0 : i32
    %c0_i32_0 = arith.constant 0 : i32
    return %c0_i32 : i32
  }
  func.func @transform_1(%arg0: i32) -> i32 {
    %c0_i32 = arith.constant 0 : i32
    %c0_i32_0 = arith.constant 0 : i32
    return %c0_i32 : i32
  }
  func.func @transform_2(%arg0: i32) -> (i32, i32) {
    %c0_i32 = arith.constant 0 : i32
    %c0_i32_0 = arith.constant 0 : i32
    return %arg0, %c0_i32 : i32, i32
  }
  func.func @transform_3(%arg0: i32) -> (i32, i32) {
    %c0_i32 = arith.constant 0 : i32
    %c0_i32_0 = arith.constant 0 : i32
    return %arg0, %c0_i32 : i32, i32
  }
}

</mosaic_0001>

<bundles_post_ra>
// kernel: tpu_custom_call.1
= control target key start
LH: loop header
LB: loop body
LE: loop exit
PB: predicated region body
PF: predicated region fallthrough
CT: control target
= control target key end

     0   :  { %10 = vsyncpa [#allocation5], 0  ;;  %s144_s0 = inlined_call_operand.<no memory space> [shape: f32[1], index: 0, kind: input, shape index: {}]   ;;  %s145_s1 = inlined_call_operand.<no memory space> [shape: f32[1], index: 1, kind: input, shape index: {}]   ;;  %s146_s2 = inlined_call_operand.hbm [shape: f32[8,128], index: 2, kind: input, shape index: {}]   ;;  %s147_s3 = inlined_call_operand.hbm [shape: f32[8,128], index: 3, kind: output, shape index: {}]  }
   0x1   :  { %11 = vsyncpa [#allocation6], 0  ;;  %s21_s14 = sshll.u32 %s146_s2, 4  ;;  %s110_s15 = smov [#allocation4]   ;;  %s22_s14 = int_to_ptr.hbm [resolvable:$true] %s21_s14 }
   0x2   :  { %s23_s16 = sshll.u32 %s110_s15, 4  ;;  %s24_s16 = int_to_ptr.vmem [resolvable:$true] %s23_s16 }
   0x3   :  { %26 = dma.hbm_to_vmem [thread:$0]  %s22_s14, 128, %s24_s16, [#allocation5]  }
   0x4   :  { %106 = dma.done.wait [#allocation5], 128  }
   0x5   :  { %107 = vsyncadd [#allocation5], 4294967168  ;;  %v33_v0 = vstv %s144_s0  ;;  %v32_v1 = vld [vmem:[#allocation4] sm:$0xff]  ;;  %v36_v2 = vstv %s145_s1  ;;  %s111_s21 = smov [#allocation7]   ;;  %s46_s24 = sshll.u32 %s147_s3, 4  ;;  %s47_s24 = int_to_ptr.hbm [resolvable:$true] %s46_s24 }
   0x6   :  { %s44_s22 = sshll.u32 %s111_s21, 4  ;;  %v34_v3 = vmul.f32 %v33_v0, %v32_v1  ;;  %s45_s22 = int_to_ptr.vmem [resolvable:$true] %s44_s22 }
   0x8   :  { %v37_v4 = vadd.f32 %v36_v2, %v34_v3 }
   0xa   :  { %38 = vst [vmem:[#allocation7] sm:$0xff] %v37_v4 }
   0xb   :  { %49 = dma.vmem_to_hbm [thread:$0]  %s45_s22, 128, %s47_s24, [#allocation6]  }
   0xc   :  { %108 = dma.done.wait [#allocation6], 128  }
   0xd   :  { %109 = vsyncadd [#allocation6], 4294967168 }
   0xe   :  { %54 = vsyncpa [#allocation5], 1 }
   0xf   :  { %55 = vsyncpa [#allocation6], 1 }

</bundles_post_ra>
